<compile_context>
chip_gen: v6e
topology: v6e:2x2x1
jax: 0.10.0
libtpu: 0.0.40
codegen_flags: <defaults>
</compile_context>

<pallas_src>
import functools

import jax
import jax.numpy as jnp
from jax import lax
from jax.experimental import pallas as pl
from jax.experimental.pallas import tpu as pltpu

# ---- static hyperparameters (from ToTLoss.__init__), baked into the kernel ----
NUM_STAGES = 3
ALPHA = (1.0, 0.5, 0.25)
BETA = (0.0, 0.3, 0.2)          # beta[0] is unused (coherence loop starts at t=1)
GAMMA = 0.07                    # evaluator temperature
LAMBDA_EVAL = 0.1
EPS = 1e-8
NEG_BIG = -1e30                 # finite stand-in for -inf diagonal mask


# ------------------------------ fused kernel -----------------------------------
def _fused_kernel(total_b,
                  logits_ref, labels_ref, h_ref, feat_ref, pos_ref,
                  cls_ref, coh_ref, evl_ref):
    T, TB, C = logits_ref.shape
    B, D = feat_ref.shape
    b = pl.program_id(0)
    inv_b = jnp.float32(1.0 / total_b)

    # ---- grid step 0: zero the scalar accumulators + evaluator InfoNCE ----
    # (features/pos use a constant index_map, so their block is resident for the whole grid)
    @pl.when(b == 0)
    def _():
        cls_ref[0, 0] = jnp.float32(0.0)
        coh_ref[0, 0] = jnp.float32(0.0)

        f = feat_ref[...].astype(jnp.float32)                           # [B, D]
        ssq = jnp.sum(f * f, axis=-1, keepdims=True)
        fn = f * lax.rsqrt(ssq + jnp.float32(1e-12))                    # EUP rsqrt, eps-guarded
        sim = lax.dot_general(fn, fn, (((1,), (1,)), ((), ())),
                              preferred_element_type=jnp.float32)       # [B, B]
        row = lax.broadcasted_iota(jnp.int32, (B, B), 0)
        col = lax.broadcasted_iota(jnp.int32, (B, B), 1)
        elogits = jnp.where(row == col, jnp.float32(NEG_BIG),
                            sim * jnp.float32(1.0 / GAMMA))             # mul by const, no divide
        m = jnp.max(elogits, axis=-1, keepdims=True)
        lse = m + jnp.log(jnp.sum(jnp.exp(elogits - m), axis=-1, keepdims=True))
        logp_e = elogits - lse                                          # log_softmax
        lbl = (col == pos_ref[...]).astype(jnp.float32)                 # [B, B]
        evl_ref[0, 0] = -jnp.sum(lbl * logp_e) * jnp.float32(1.0 / B)

    # ---- classification + coherence for this batch tile ----
    col_c = lax.broadcasted_iota(jnp.int32, (TB, C), 1)                 # hoisted out of stage loop

    cls_acc = jnp.float32(0.0)
    coh_acc = jnp.float32(0.0)
    p_prev = None
    for t in range(T):
        lg = logits_ref[t].astype(jnp.float32)                          # [TB, C]
        m = jnp.max(lg, axis=1, keepdims=True)
        e = jnp.exp(lg - m)
        s = jnp.sum(e, axis=1, keepdims=True)
        logp = lg - (m + jnp.log(s))                                    # log-softmax, reused below

        # classification: -alpha[t] * sum_i logp[i, label[i]]
        one_hot = (col_c == labels_ref[t]).astype(jnp.float32)          # [TB, C]
        cls_acc = cls_acc - jnp.float32(ALPHA[t]) * jnp.sum(one_hot * logp)

        # coherence: beta[t] * sum(P_adj * (log P_adj - log P_t)), P_adj = clamp(P_{t-1} @ H)
        if t >= 1:
            h = h_ref[t - 1].astype(jnp.float32)                        # [C, C]
            p_adj = jnp.maximum(
                jnp.dot(p_prev, h, preferred_element_type=jnp.float32), EPS)
            coh_acc = coh_acc + jnp.float32(BETA[t]) * jnp.sum(
                p_adj * (jnp.log(p_adj) - logp))

        # carry softmax probabilities to the next stage (reuses e, s; no recompute)
        if t < T - 1:
            p_prev = e / s

    # accumulate (already scaled by 1/B so no finalize step is needed)
    cls_ref[0, 0] += cls_acc * inv_b
    coh_ref[0, 0] += coh_acc * inv_b


# ------------------------------- wrapper ---------------------------------------
def tot_loss(logits, labels, H, features, positive_indices, *, batch_tile=None):
    """logits [T,B,C] f32/bf16, labels [T,B] i32, H [T-1,C,C] f32,
       features [B,D] f32/bf16, positive_indices [B] i32."""
    T, B, C = logits.shape
    _, D = features.shape
    if batch_tile is None:
        batch_tile = B
    assert B % batch_tile == 0, "TODO(synk): ragged final batch tile not handled"
    nb = B // batch_tile

    # Reshape is HBM-free; batch stays on the sublane axis inside the kernel so the
    # one-hot compares need no lane->sublane relayout. Padded footprint of these int
    # blocks (<= 512*T*TB bytes) is negligible next to the logits tile for C >= 128.
    labels3 = labels.reshape(T, B, 1).astype(jnp.int32)
    pos2 = positive_indices.reshape(B, 1).astype(jnp.int32)

    kernel = functools.partial(_fused_kernel, B)
    smem_scalar = lambda: pl.BlockSpec((1, 1), lambda b: (0, 0),
                                       memory_space=pltpu.MemorySpace.SMEM)

    cls, coh, evl = pl.pallas_call(
        kernel,
        grid=(nb,),
        in_specs=[
            pl.BlockSpec((T, batch_tile, C), lambda b: (0, b, 0)),   # logits, tiled over batch
            pl.BlockSpec((T, batch_tile, 1), lambda b: (0, b, 0)),   # labels, tiled over batch
            pl.BlockSpec((T - 1, C, C), lambda b: (0, 0, 0)),        # H, resident
            pl.BlockSpec((B, D), lambda b: (0, 0)),                  # features, resident
            pl.BlockSpec((B, 1), lambda b: (0, 0)),                  # positive indices, resident
        ],
        out_specs=(smem_scalar(), smem_scalar(), smem_scalar()),
        out_shape=(jax.ShapeDtypeStruct((1, 1), jnp.float32),
                   jax.ShapeDtypeStruct((1, 1), jnp.float32),
                   jax.ShapeDtypeStruct((1, 1), jnp.float32)),
        compiler_params=pltpu.CompilerParams(
            # Batch axis accumulates into shared SMEM scalars -> "arbitrary".
            # TODO(synk): for v7x megacore, emit per-core partial sums and mark "parallel".
            dimension_semantics=("arbitrary",)),
    )(logits, labels3, H, features, pos2)

    L_cls = cls[0, 0]
    L_coh = coh[0, 0]
    L_evl = evl[0, 0]
    L_total = L_cls + L_coh + jnp.float32(LAMBDA_EVAL) * L_evl
    return L_total, L_cls, L_coh, L_evl


# ------------------------------ pure-JAX reference ------------------------------
def ref_tot_loss(logits, labels, H, features, positive_indices):
    T, B, C = logits.shape
    L_cls = 0.0
    for t in range(T):
        lp = jax.nn.log_softmax(logits[t], axis=1)
        ce = -jnp.mean(lp[jnp.arange(B), labels[t]])
        L_cls = L_cls + ALPHA[t] * ce
    L_coh = 0.0
    for t in range(1, T):
        P_t = jax.nn.softmax(logits[t], axis=1)
        P_prev = jax.nn.softmax(logits[t - 1], axis=1)
        P_adj = jnp.maximum(P_prev @ H[t - 1], EPS)
        kl = jnp.sum(P_adj * (jnp.log(P_adj) - jnp.log(P_t))) / B
        L_coh = L_coh + BETA[t] * kl
    f = features / jnp.linalg.norm(features, axis=-1, keepdims=True)
    sim = f @ f.T
    sim = jnp.where(jnp.eye(B, dtype=bool), NEG_BIG, sim / GAMMA)
    lp = jax.nn.log_softmax(sim, axis=-1)
    lbl = (jnp.arange(B)[None, :] == positive_indices[:, None]).astype(jnp.float32)
    L_evl = jnp.mean(-jnp.sum(lbl * lp, axis=-1))
    return L_cls + L_coh + LAMBDA_EVAL * L_evl, L_cls, L_coh, L_evl


if __name__ == "__main__":
    T, B, C, D = NUM_STAGES, 8, 16, 32
    key = jax.random.PRNGKey(0)
    k1, k2, k3, k4 = jax.random.split(key, 4)

    logits = jax.random.normal(k1, (T, B, C), dtype=jnp.float32)
    labels = jax.random.randint(k2, (T, B), 0, C).astype(jnp.int32)
    # deterministic row-stochastic adjacency matrices (shape from __init__'s H_matrices)
    H = jax.nn.softmax(jax.random.normal(k3, (T - 1, C, C), dtype=jnp.float32), axis=-1)
    features = jax.random.normal(k4, (B, D), dtype=jnp.float32)
    positive_indices = ((jnp.arange(B) + 1) % B).astype(jnp.int32)  # no self-positives

    out = tot_loss(logits, labels, H, features, positive_indices)
    out = jax.block_until_ready(out)

    ref = ref_tot_loss(logits, labels, H, features, positive_indices)

    for got, exp in zip(out, ref):
        assert jnp.isfinite(got), f"non-finite kernel output: {got}"
        assert jnp.allclose(got, exp, rtol=1e-4, atol=1e-5), f"mismatch: {got} vs {exp}"

    print("KERNEL_OK")
</pallas_src>

<mosaic_0001>
module attributes {stable_mosaic.version = 11 : i64} {
  func.func @_fused_kernel(%arg0: i32, %arg1: memref<3x8x16xf32, #tpu.memory_space<vmem>>, %arg2: memref<3x8x1xi32, #tpu.memory_space<vmem>>, %arg3: memref<2x16x16xf32, #tpu.memory_space<vmem>>, %arg4: memref<8x32xf32, #tpu.memory_space<vmem>>, %arg5: memref<8x1xi32, #tpu.memory_space<vmem>>, %arg6: memref<1x1xf32, #tpu.memory_space<smem>>, %arg7: memref<1x1xf32, #tpu.memory_space<smem>>, %arg8: memref<1x1xf32, #tpu.memory_space<smem>>) attributes {dimension_semantics = [#tpu.dimension_semantics<arbitrary>], iteration_bounds = array<i64: 1>, scalar_prefetch = 0 : i64, scratch_operands = 0 : i64, tpu.core_type = #tpu.core_type<tc>, window_params = [{transform_indices = @transform_0, window_bounds = array<i64: 3, 8, 16>}, {transform_indices = @transform_1, window_bounds = array<i64: 3, 8, 1>}, {pipeline_mode = #tpu.pipeline_mode<synchronous>, transform_indices = @transform_2, window_bounds = array<i64: 2, 16, 16>}, {pipeline_mode = #tpu.pipeline_mode<synchronous>, transform_indices = @transform_3, window_bounds = array<i64: 8, 32>}, {pipeline_mode = #tpu.pipeline_mode<synchronous>, transform_indices = @transform_4, window_bounds = array<i64: 8, 1>}, {transform_indices = @transform_5, window_bounds = array<i64: 1, 1>}, {transform_indices = @transform_6, window_bounds = array<i64: 1, 1>}, {transform_indices = @transform_7, window_bounds = array<i64: 1, 1>}]} {
    %c0_i32 = arith.constant 0 : i32
    %0 = arith.cmpi eq, %arg0, %c0_i32 : i32
    %1 = arith.extui %0 : i1 to i32
    %c0_i32_0 = arith.constant 0 : i32
    %2 = arith.cmpi ne, %1, %c0_i32_0 : i32
    scf.if %2 {
      %cst_53 = arith.constant 0.000000e+00 : f32
      %c0_54 = arith.constant 0 : index
      %c0_55 = arith.constant 0 : index
      %122 = memref.load %arg6[%c0_54, %c0_55] : memref<1x1xf32, #tpu.memory_space<smem>>
      memref.store %cst_53, %arg6[%c0_54, %c0_55] : memref<1x1xf32, #tpu.memory_space<smem>>
      %cst_56 = arith.constant 0.000000e+00 : f32
      %c0_57 = arith.constant 0 : index
      %c0_58 = arith.constant 0 : index
      %123 = memref.load %arg7[%c0_57, %c0_58] : memref<1x1xf32, #tpu.memory_space<smem>>
      memref.store %cst_56, %arg7[%c0_57, %c0_58] : memref<1x1xf32, #tpu.memory_space<smem>>
      %c0_59 = arith.constant 0 : index
      %c0_60 = arith.constant 0 : index
      %124 = vector.load %arg4[%c0_59, %c0_60] : memref<8x32xf32, #tpu.memory_space<vmem>>, vector<8x32xf32>
      %125 = arith.mulf %124, %124 : vector<8x32xf32>
      %cst_61 = arith.constant dense<0.000000e+00> : vector<8xf32>
      %126 = vector.multi_reduction <add>, %125, %cst_61 [1] : vector<8x32xf32> to vector<8xf32>
      %127 = vector.shape_cast %126 : vector<8xf32> to vector<8x1xf32>
      %cst_62 = arith.constant 9.99999996E-13 : f32
      %128 = vector.broadcast %cst_62 : f32 to vector<8x1xf32>
      %129 = arith.addf %127, %128 : vector<8x1xf32>
      %130 = math.rsqrt %129 : vector<8x1xf32>
      %131 = vector.broadcast %130 : vector<8x1xf32> to vector<8x32xf32>
      %132 = arith.mulf %124, %131 : vector<8x32xf32>
      %cst_63 = arith.constant dense<0.000000e+00> : vector<8x8xf32>
      %133 = tpu.matmul %132, %132, %cst_63 {dimension_numbers = #tpu.dot_dimension_numbers<[1], [1], [0], [0], [0, 0, 1, 0], [], []>} : vector<8x32xf32>, vector<8x32xf32>, vector<8x8xf32> -> vector<8x8xf32>
      %134 = tpu.iota {dimensions = array<i32: 0>} : vector<8x8xi32>
      %135 = tpu.iota {dimensions = array<i32: 1>} : vector<8x8xi32>
      %136 = arith.cmpi eq, %134, %135 : vector<8x8xi32>
      %cst_64 = arith.constant 14.2857141 : f32
      %137 = vector.broadcast %cst_64 : f32 to vector<8x8xf32>
      %138 = arith.mulf %133, %137 : vector<8x8xf32>
      %cst_65 = arith.constant -1.000000e+30 : f32
      %139 = vector.broadcast %cst_65 : f32 to vector<8x8xf32>
      %140 = arith.select %136, %139, %138 : vector<8x8xi1>, vector<8x8xf32>
      %cst_66 = arith.constant dense<0xFF800000> : vector<8xf32>
      %141 = vector.multi_reduction <maximumf>, %140, %cst_66 [1] : vector<8x8xf32> to vector<8xf32>
      %142 = vector.shape_cast %141 : vector<8xf32> to vector<8x1xf32>
      %143 = vector.broadcast %142 : vector<8x1xf32> to vector<8x8xf32>
      %144 = arith.subf %140, %143 : vector<8x8xf32>
      %145 = math.exp %144 : vector<8x8xf32>
      %cst_67 = arith.constant dense<0.000000e+00> : vector<8xf32>
      %146 = vector.multi_reduction <add>, %145, %cst_67 [1] : vector<8x8xf32> to vector<8xf32>
      %147 = vector.shape_cast %146 : vector<8xf32> to vector<8x1xf32>
      %148 = math.log %147 : vector<8x1xf32>
      %149 = arith.addf %142, %148 : vector<8x1xf32>
      %150 = vector.broadcast %149 : vector<8x1xf32> to vector<8x8xf32>
      %151 = arith.subf %140, %150 : vector<8x8xf32>
      %c0_68 = arith.constant 0 : index
      %c0_69 = arith.constant 0 : index
      %152 = vector.load %arg5[%c0_68, %c0_69] : memref<8x1xi32, #tpu.memory_space<vmem>>, vector<8x1xi32>
      %153 = vector.broadcast %152 : vector<8x1xi32> to vector<8x8xi32>
      %154 = arith.cmpi eq, %135, %153 : vector<8x8xi32>
      %155 = arith.extui %154 : vector<8x8xi1> to vector<8x8xi32>
      %156 = arith.sitofp %155 : vector<8x8xi32> to vector<8x8xf32>
      %157 = arith.mulf %156, %151 : vector<8x8xf32>
      %158 = vector.shape_cast %157 : vector<8x8xf32> to vector<1x8x8xf32>
      %cst_70 = arith.constant dense<0.000000e+00> : vector<1xf32>
      %159 = vector.multi_reduction <add>, %158, %cst_70 [1, 2] : vector<1x8x8xf32> to vector<1xf32>
      %160 = vector.shape_cast %159 : vector<1xf32> to vector<1x1x1xf32>
      %161 = vector.extract %160[0, 0, 0] : f32 from vector<1x1x1xf32>
      %cst_71 = arith.constant 0.000000e+00 : f32
      %162 = arith.subf %cst_71, %161 : f32
      %cst_72 = arith.constant 1.250000e-01 : f32
      %163 = arith.mulf %162, %cst_72 : f32
      %c0_73 = arith.constant 0 : index
      %c0_74 = arith.constant 0 : index
      %164 = memref.load %arg8[%c0_73, %c0_74] : memref<1x1xf32, #tpu.memory_space<smem>>
      memref.store %163, %arg8[%c0_73, %c0_74] : memref<1x1xf32, #tpu.memory_space<smem>>
    } else {
    }
    %3 = tpu.iota {dimensions = array<i32: 1>} : vector<8x16xi32>
    %c0 = arith.constant 0 : index
    %c0_1 = arith.constant 0 : index
    %c0_2 = arith.constant 0 : index
    %4 = vector.load %arg1[%c0, %c0_1, %c0_2] : memref<3x8x16xf32, #tpu.memory_space<vmem>>, vector<1x8x16xf32>
    %5 = vector.shape_cast %4 : vector<1x8x16xf32> to vector<8x16xf32>
    %cst = arith.constant dense<0xFF800000> : vector<8xf32>
    %6 = vector.multi_reduction <maximumf>, %5, %cst [1] : vector<8x16xf32> to vector<8xf32>
    %7 = vector.shape_cast %6 : vector<8xf32> to vector<8x1xf32>
    %8 = vector.broadcast %7 : vector<8x1xf32> to vector<8x16xf32>
    %9 = arith.subf %5, %8 : vector<8x16xf32>
    %10 = math.exp %9 : vector<8x16xf32>
    %cst_3 = arith.constant dense<0.000000e+00> : vector<8xf32>
    %11 = vector.multi_reduction <add>, %10, %cst_3 [1] : vector<8x16xf32> to vector<8xf32>
    %12 = vector.shape_cast %11 : vector<8xf32> to vector<8x1xf32>
    %13 = math.log %12 : vector<8x1xf32>
    %14 = arith.addf %7, %13 : vector<8x1xf32>
    %15 = vector.broadcast %14 : vector<8x1xf32> to vector<8x16xf32>
    %16 = arith.subf %5, %15 : vector<8x16xf32>
    %c0_4 = arith.constant 0 : index
    %c0_5 = arith.constant 0 : index
    %c0_6 = arith.constant 0 : index
    %17 = vector.load %arg2[%c0_4, %c0_5, %c0_6] : memref<3x8x1xi32, #tpu.memory_space<vmem>>, vector<1x8x1xi32>
    %18 = vector.shape_cast %17 : vector<1x8x1xi32> to vector<8x1xi32>
    %19 = vector.broadcast %18 : vector<8x1xi32> to vector<8x16xi32>
    %20 = arith.cmpi eq, %3, %19 : vector<8x16xi32>
    %21 = arith.extui %20 : vector<8x16xi1> to vector<8x16xi32>
    %22 = arith.sitofp %21 : vector<8x16xi32> to vector<8x16xf32>
    %23 = arith.mulf %22, %16 : vector<8x16xf32>
    %24 = vector.shape_cast %23 : vector<8x16xf32> to vector<1x8x16xf32>
    %cst_7 = arith.constant dense<0.000000e+00> : vector<1xf32>
    %25 = vector.multi_reduction <add>, %24, %cst_7 [1, 2] : vector<1x8x16xf32> to vector<1xf32>
    %26 = vector.shape_cast %25 : vector<1xf32> to vector<1x1x1xf32>
    %27 = vector.extract %26[0, 0, 0] : f32 from vector<1x1x1xf32>
    %cst_8 = arith.constant 1.000000e+00 : f32
    %28 = arith.mulf %cst_8, %27 : f32
    %cst_9 = arith.constant 0.000000e+00 : f32
    %29 = arith.subf %cst_9, %28 : f32
    %30 = vector.broadcast %12 : vector<8x1xf32> to vector<8x16xf32>
    %31 = arith.divf %10, %30 : vector<8x16xf32>
    %c1 = arith.constant 1 : index
    %c0_10 = arith.constant 0 : index
    %c0_11 = arith.constant 0 : index
    %32 = vector.load %arg1[%c1, %c0_10, %c0_11] : memref<3x8x16xf32, #tpu.memory_space<vmem>>, vector<1x8x16xf32>
    %33 = vector.shape_cast %32 : vector<1x8x16xf32> to vector<8x16xf32>
    %cst_12 = arith.constant dense<0xFF800000> : vector<8xf32>
    %34 = vector.multi_reduction <maximumf>, %33, %cst_12 [1] : vector<8x16xf32> to vector<8xf32>
    %35 = vector.shape_cast %34 : vector<8xf32> to vector<8x1xf32>
    %36 = vector.broadcast %35 : vector<8x1xf32> to vector<8x16xf32>
    %37 = arith.subf %33, %36 : vector<8x16xf32>
    %38 = math.exp %37 : vector<8x16xf32>
    %cst_13 = arith.constant dense<0.000000e+00> : vector<8xf32>
    %39 = vector.multi_reduction <add>, %38, %cst_13 [1] : vector<8x16xf32> to vector<8xf32>
    %40 = vector.shape_cast %39 : vector<8xf32> to vector<8x1xf32>
    %41 = math.log %40 : vector<8x1xf32>
    %42 = arith.addf %35, %41 : vector<8x1xf32>
    %43 = vector.broadcast %42 : vector<8x1xf32> to vector<8x16xf32>
    %44 = arith.subf %33, %43 : vector<8x16xf32>
    %c1_14 = arith.constant 1 : index
    %c0_15 = arith.constant 0 : index
    %c0_16 = arith.constant 0 : index
    %45 = vector.load %arg2[%c1_14, %c0_15, %c0_16] : memref<3x8x1xi32, #tpu.memory_space<vmem>>, vector<1x8x1xi32>
    %46 = vector.shape_cast %45 : vector<1x8x1xi32> to vector<8x1xi32>
    %47 = vector.broadcast %46 : vector<8x1xi32> to vector<8x16xi32>
    %48 = arith.cmpi eq, %3, %47 : vector<8x16xi32>
    %49 = arith.extui %48 : vector<8x16xi1> to vector<8x16xi32>
    %50 = arith.sitofp %49 : vector<8x16xi32> to vector<8x16xf32>
    %51 = arith.mulf %50, %44 : vector<8x16xf32>
    %52 = vector.shape_cast %51 : vector<8x16xf32> to vector<1x8x16xf32>
    %cst_17 = arith.constant dense<0.000000e+00> : vector<1xf32>
    %53 = vector.multi_reduction <add>, %52, %cst_17 [1, 2] : vector<1x8x16xf32> to vector<1xf32>
    %54 = vector.shape_cast %53 : vector<1xf32> to vector<1x1x1xf32>
    %55 = vector.extract %54[0, 0, 0] : f32 from vector<1x1x1xf32>
    %cst_18 = arith.constant 5.000000e-01 : f32
    %56 = arith.mulf %cst_18, %55 : f32
    %57 = arith.subf %29, %56 : f32
    %c0_19 = arith.constant 0 : index
    %c0_20 = arith.constant 0 : index
    %c0_21 = arith.constant 0 : index
    %58 = vector.load %arg3[%c0_19, %c0_20, %c0_21] : memref<2x16x16xf32, #tpu.memory_space<vmem>>, vector<1x16x16xf32>
    %59 = vector.shape_cast %58 : vector<1x16x16xf32> to vector<16x16xf32>
    %cst_22 = arith.constant dense<0.000000e+00> : vector<8x16xf32>
    %60 = tpu.matmul %31, %59, %cst_22 {dimension_numbers = #tpu.dot_dimension_numbers<[1], [0], [0], [1], [0, 0, 1, 1], [], []>} : vector<8x16xf32>, vector<16x16xf32>, vector<8x16xf32> -> vector<8x16xf32>
    %cst_23 = arith.constant 9.99999993E-9 : f32
    %61 = vector.broadcast %cst_23 : f32 to vector<8x16xf32>
    %62 = arith.maximumf %60, %61 : vector<8x16xf32>
    %63 = math.log %62 : vector<8x16xf32>
    %64 = arith.subf %63, %44 : vector<8x16xf32>
    %65 = arith.mulf %62, %64 : vector<8x16xf32>
    %66 = vector.shape_cast %65 : vector<8x16xf32> to vector<1x8x16xf32>
    %cst_24 = arith.constant dense<0.000000e+00> : vector<1xf32>
    %67 = vector.multi_reduction <add>, %66, %cst_24 [1, 2] : vector<1x8x16xf32> to vector<1xf32>
    %68 = vector.shape_cast %67 : vector<1xf32> to vector<1x1x1xf32>
    %69 = vector.extract %68[0, 0, 0] : f32 from vector<1x1x1xf32>
    %cst_25 = arith.constant 3.000000e-01 : f32
    %70 = arith.mulf %cst_25, %69 : f32
    %cst_26 = arith.constant 0.000000e+00 : f32
    %71 = arith.addf %cst_26, %70 : f32
    %72 = vector.broadcast %40 : vector<8x1xf32> to vector<8x16xf32>
    %73 = arith.divf %38, %72 : vector<8x16xf32>
    %c2 = arith.constant 2 : index
    %c0_27 = arith.constant 0 : index
    %c0_28 = arith.constant 0 : index
    %74 = vector.load %arg1[%c2, %c0_27, %c0_28] : memref<3x8x16xf32, #tpu.memory_space<vmem>>, vector<1x8x16xf32>
    %75 = vector.shape_cast %74 : vector<1x8x16xf32> to vector<8x16xf32>
    %cst_29 = arith.constant dense<0xFF800000> : vector<8xf32>
    %76 = vector.multi_reduction <maximumf>, %75, %cst_29 [1] : vector<8x16xf32> to vector<8xf32>
    %77 = vector.shape_cast %76 : vector<8xf32> to vector<8x1xf32>
    %78 = vector.broadcast %77 : vector<8x1xf32> to vector<8x16xf32>
    %79 = arith.subf %75, %78 : vector<8x16xf32>
    %80 = math.exp %79 : vector<8x16xf32>
    %cst_30 = arith.constant dense<0.000000e+00> : vector<8xf32>
    %81 = vector.multi_reduction <add>, %80, %cst_30 [1] : vector<8x16xf32> to vector<8xf32>
    %82 = vector.shape_cast %81 : vector<8xf32> to vector<8x1xf32>
    %83 = math.log %82 : vector<8x1xf32>
    %84 = arith.addf %77, %83 : vector<8x1xf32>
    %85 = vector.broadcast %84 : vector<8x1xf32> to vector<8x16xf32>
    %86 = arith.subf %75, %85 : vector<8x16xf32>
    %c2_31 = arith.constant 2 : index
    %c0_32 = arith.constant 0 : index
    %c0_33 = arith.constant 0 : index
    %87 = vector.load %arg2[%c2_31, %c0_32, %c0_33] : memref<3x8x1xi32, #tpu.memory_space<vmem>>, vector<1x8x1xi32>
    %88 = vector.shape_cast %87 : vector<1x8x1xi32> to vector<8x1xi32>
    %89 = vector.broadcast %88 : vector<8x1xi32> to vector<8x16xi32>
    %90 = arith.cmpi eq, %3, %89 : vector<8x16xi32>
    %91 = arith.extui %90 : vector<8x16xi1> to vector<8x16xi32>
    %92 = arith.sitofp %91 : vector<8x16xi32> to vector<8x16xf32>
    %93 = arith.mulf %92, %86 : vector<8x16xf32>
    %94 = vector.shape_cast %93 : vector<8x16xf32> to vector<1x8x16xf32>
    %cst_34 = arith.constant dense<0.000000e+00> : vector<1xf32>
    %95 = vector.multi_reduction <add>, %94, %cst_34 [1, 2] : vector<1x8x16xf32> to vector<1xf32>
    %96 = vector.shape_cast %95 : vector<1xf32> to vector<1x1x1xf32>
    %97 = vector.extract %96[0, 0, 0] : f32 from vector<1x1x1xf32>
    %cst_35 = arith.constant 2.500000e-01 : f32
    %98 = arith.mulf %cst_35, %97 : f32
    %99 = arith.subf %57, %98 : f32
    %c1_36 = arith.constant 1 : index
    %c0_37 = arith.constant 0 : index
    %c0_38 = arith.constant 0 : index
    %100 = vector.load %arg3[%c1_36, %c0_37, %c0_38] : memref<2x16x16xf32, #tpu.memory_space<vmem>>, vector<1x16x16xf32>
    %101 = vector.shape_cast %100 : vector<1x16x16xf32> to vector<16x16xf32>
    %cst_39 = arith.constant dense<0.000000e+00> : vector<8x16xf32>
    %102 = tpu.matmul %73, %101, %cst_39 {dimension_numbers = #tpu.dot_dimension_numbers<[1], [0], [0], [1], [0, 0, 1, 1], [], []>} : vector<8x16xf32>, vector<16x16xf32>, vector<8x16xf32> -> vector<8x16xf32>
    %cst_40 = arith.constant 9.99999993E-9 : f32
    %103 = vector.broadcast %cst_40 : f32 to vector<8x16xf32>
    %104 = arith.maximumf %102, %103 : vector<8x16xf32>
    %105 = math.log %104 : vector<8x16xf32>
    %106 = arith.subf %105, %86 : vector<8x16xf32>
    %107 = arith.mulf %104, %106 : vector<8x16xf32>
    %108 = vector.shape_cast %107 : vector<8x16xf32> to vector<1x8x16xf32>
    %cst_41 = arith.constant dense<0.000000e+00> : vector<1xf32>
    %109 = vector.multi_reduction <add>, %108, %cst_41 [1, 2] : vector<1x8x16xf32> to vector<1xf32>
    %110 = vector.shape_cast %109 : vector<1xf32> to vector<1x1x1xf32>
    %111 = vector.extract %110[0, 0, 0] : f32 from vector<1x1x1xf32>
    %cst_42 = arith.constant 2.000000e-01 : f32
    %112 = arith.mulf %cst_42, %111 : f32
    %113 = arith.addf %71, %112 : f32
    %c0_43 = arith.constant 0 : index
    %c0_44 = arith.constant 0 : index
    %114 = memref.load %arg6[%c0_43, %c0_44] : memref<1x1xf32, #tpu.memory_space<smem>>
    %cst_45 = arith.constant 1.250000e-01 : f32
    %115 = arith.mulf %99, %cst_45 : f32
    %116 = arith.addf %114, %115 : f32
    %c0_46 = arith.constant 0 : index
    %c0_47 = arith.constant 0 : index
    %117 = memref.load %arg6[%c0_46, %c0_47] : memref<1x1xf32, #tpu.memory_space<smem>>
    memref.store %116, %arg6[%c0_46, %c0_47] : memref<1x1xf32, #tpu.memory_space<smem>>
    %c0_48 = arith.constant 0 : index
    %c0_49 = arith.constant 0 : index
    %118 = memref.load %arg7[%c0_48, %c0_49] : memref<1x1xf32, #tpu.memory_space<smem>>
    %cst_50 = arith.constant 1.250000e-01 : f32
    %119 = arith.mulf %113, %cst_50 : f32
    %120 = arith.addf %118, %119 : f32
    %c0_51 = arith.constant 0 : index
    %c0_52 = arith.constant 0 : index
    %121 = memref.load %arg7[%c0_51, %c0_52] : memref<1x1xf32, #tpu.memory_space<smem>>
    memref.store %120, %arg7[%c0_51, %c0_52] : memref<1x1xf32, #tpu.memory_space<smem>>
    return
  }
  func.func @transform_0(%arg0: i32) -> (i32, i32, i32) {
    %c0_i32 = arith.constant 0 : i32
    %c0_i32_0 = arith.constant 0 : i32
    %c0_i32_1 = arith.constant 0 : i32
    return %c0_i32, %arg0, %c0_i32_0 : i32, i32, i32
  }
  func.func @transform_1(%arg0: i32) -> (i32, i32, i32) {
    %c0_i32 = arith.constant 0 : i32
    %c0_i32_0 = arith.constant 0 : i32
    %c0_i32_1 = arith.constant 0 : i32
    return %c0_i32, %arg0, %c0_i32_0 : i32, i32, i32
  }
  func.func @transform_2(%arg0: i32) -> (i32, i32, i32) {
    %c0_i32 = arith.constant 0 : i32
    %c0_i32_0 = arith.constant 0 : i32
    %c0_i32_1 = arith.constant 0 : i32
    %c0_i32_2 = arith.constant 0 : i32
    return %c0_i32, %c0_i32_0, %c0_i32_1 : i32, i32, i32
  }
  func.func @transform_3(%arg0: i32) -> (i32, i32) {
    %c0_i32 = arith.constant 0 : i32
    %c0_i32_0 = arith.constant 0 : i32
    %c0_i32_1 = arith.constant 0 : i32
    return %c0_i32, %c0_i32_0 : i32, i32
  }
  func.func @transform_4(%arg0: i32) -> (i32, i32) {
    %c0_i32 = arith.constant 0 : i32
    %c0_i32_0 = arith.constant 0 : i32
    %c0_i32_1 = arith.constant 0 : i32
    return %c0_i32, %c0_i32_0 : i32, i32
  }
  func.func @transform_5(%arg0: i32) -> (i32, i32) {
    %c0_i32 = arith.constant 0 : i32
    %c0_i32_0 = arith.constant 0 : i32
    %c0_i32_1 = arith.constant 0 : i32
    return %c0_i32, %c0_i32_0 : i32, i32
  }
  func.func @transform_6(%arg0: i32) -> (i32, i32) {
    %c0_i32 = arith.constant 0 : i32
    %c0_i32_0 = arith.constant 0 : i32
    %c0_i32_1 = arith.constant 0 : i32
    return %c0_i32, %c0_i32_0 : i32, i32
  }
  func.func @transform_7(%arg0: i32) -> (i32, i32) {
    %c0_i32 = arith.constant 0 : i32
    %c0_i32_0 = arith.constant 0 : i32
    %c0_i32_1 = arith.constant 0 : i32
    return %c0_i32, %c0_i32_0 : i32, i32
  }
}

</mosaic_0001>

<bundles_post_ra>
// kernel: tpu_custom_call.1
= control target key start
LH: loop header
LB: loop body
LE: loop exit
PB: predicated region body
PF: predicated region fallthrough
CT: control target
= control target key end

     0   :  { %13 = vsyncpa [#allocation3], 0  ;;  %s819_s0 = inlined_call_operand.hbm [shape: f32[3,8,16], index: 0, kind: input, shape index: {}]   ;;  %s820_s1 = inlined_call_operand.vmem [shape: s32[3,8,1], index: 1, kind: input, shape index: {}]   ;;  %s821_s2 = inlined_call_operand.vmem [shape: f32[2,16,16], index: 2, kind: input, shape index: {}]   ;;  %s822_s3 = inlined_call_operand.vmem [shape: f32[8,32], index: 3, kind: input, shape index: {}]   ;;  %s823_s4 = inlined_call_operand.vmem [shape: s32[8,1], index: 4, kind: input, shape index: {}]   ;;  %s824_s5 = inlined_call_operand.hbm [shape: f32[1,1], index: 5, kind: output, shape index: {0}]   ;;  %s825_s6 = inlined_call_operand.hbm [shape: f32[1,1], index: 6, kind: output, shape index: {1}]   ;;  %s826_s7 = inlined_call_operand.hbm [shape: f32[1,1], index: 7, kind: output, shape index: {2}]  }
   0x1   :  { %14 = vsyncpa [#allocation4], 0 }
   0x2   :  { %15 = vsyncpa [#allocation7], 0  ;;  %s655_s24 = smov [#allocation2]  }
   0x3   :  { %s21_s25 = sshll.u32 %s655_s24, 4  ;;  %s22_s25 = int_to_ptr.vmem [resolvable:$true] %s21_s25 }
   0x4   :  { %s613_s26 = scalar_lea.vmem %s22_s25, 384  ;;  %p618_p1 = scmp.lt.s32.totalorder %s22_s25, %s22_s25 }
   0x5   :  { %p614_p0 = scmp.ne.s32.totalorder %s22_s25, %s613_s26  ;;  %p619_p2 = scmp.lt.s32.totalorder %s613_s26, %s613_s26 }
   0x7   :  { %p620_p3 = por %p619_p2, %p618_p1 }
   0x9   :  { %p621_p4 = pnand %p620_p3, %p614_p0 }
   0xb   :  { %624 = shalt.err (!%p621_p4)
}
   0xc   :  { %s656_s27 = smov 128   ;;  %s657_s28 = smov 8  }
   0xd   :  { %27 = dma.hbm_to_vmem [thread:$0]  %s819_s0, 384, %s22_s25, [#allocation3], %s656_s27, %s656_s27, %s657_s28  }
   0xe   :  { %649 = dma.done.wait [#allocation3], 384  }
   0xf   :  { %650 = vsyncadd [#allocation3], 4294966912  ;;  %vm175_vm0 = vcmask 130048   ;;  %v707_v0 = vld [vmem:[#allocation2 + $0x8] sm:$0xff]  ;;  %v47_v1 = vld [vmem:[%s822_s3] sm:$0xff]  ;;  %vm49_vm1 = vcmask 261120   ;;  %v129_v42 = vlaneseq }
  0x10   :  { %v212_v2 = vsel %vm175_vm0, %v707_v0, -inf  ;;  %v48_v3 = vmul.f32 %v47_v1, %v47_v1  ;;  %v714_v4 = vld [vmem:[#allocation2] sm:$0xff]  ;;  %v658_v7 = vmov 0.0   ;;  %vm659_vm2 = vmmov 0   ;;  %v736_v21 = vld [vmem:[#allocation2 + $0x10] sm:$0xff]  ;;  %v526_v24 = vld [vmem:[%s821_s2 + $0x18] sm:$0xff] }
  0x11   :  { %213 = vmax.xlane.f32.xlu1 %v212_v2  ;;  %v176_v6 = vsel %vm175_vm0, %v714_v4, -inf  ;;  %536 = vmatprep.subr.mxu0 %v658_v7  ;;  %v342_v23 = vsel %vm175_vm0, %v736_v21, -inf  ;;  %v525_v25 = vld [vmem:[%s821_s2 + $0x10] sm:$0xff]  ;;  %v247_v26 = vld [vmem:[%s821_s2 + $0x8] sm:$0xff]  ;;  %v246_v27 = vld [vmem:[%s821_s2] sm:$0xff]  ;;  %v660_v28 = vmov 0  }
  0x12   :  { %v50_v5 = vsel %vm49_vm1, %v48_v3, 0.0  ;;  %541 = vmatprep.subr.mxu1 %v658_v7  ;;  %538 = vmatprep.mubr.msk.f32.mxu0 %vm659_vm2, %v658_v7  ;;  %v150_v40 = vld [vmem:[%s823_s4] sm:$0xff]  ;;  %v520_v41 = vld [vmem:[%s820_s1 + $0x8] sm:$0xff]  ;;  %v523_v43 = vld [vmem:[%s820_s1 + $0x10] sm:$0xff]  ;;  %v130_v44 = vshrl.u32 %v129_v42, 7  ;;  %v774_v45 = vand.u32 127, %v129_v42 }
  0x13   :  { %51 = vadd.xlane.f32.xlu0 %v50_v5  ;;  %545 = vmatprep.mubr.msk.f32.mxu1 %vm659_vm2, %v658_v7  ;;  %vm136_vm4 = vcmask 64512   ;;  %s661_s14 = smov [#allocation6]   ;;  %s662_s16 = smov [#allocation5]  }
  0x14   :  { %542 = vmatpush3.msra.mxu1 %v247_v26  ;;  %577 = vset.pattern.permute.xlu1 %v660_v28  ;;  %vm133_vm3 = vcmp.eq.s32.totalorder %v130_v44, %v774_v45  ;;  %s663_s19 = smov [#allocation8]  }
  0x15   :  { %543 = vmatprep.subr.mxu1 %v658_v7  ;;  %578 = vset.pattern.permute.xlu0 %v660_v28  ;;  %v189_v28 = vld [vmem:[%s820_s1] sm:$0xff] }
  0x16   :  { %544 = vmatpush3.msra.mxu1 %v246_v27 }
  0x17   :  { %177 = vmax.xlane.f32.xlu0 %v176_v6 }
  0x9a   :  { %v725_v8 = vpop.xlane.xlu1 %213 }
  0x9b   :  { %v215_v9 = vsub.f32 %v707_v0, %v725_v8 }
  0x9c   :  { %v52_v10 = vpop.xlane.xlu0 %51 }
  0x9d   :  { %v216_v11 = vmul.f32 1.442695, %v215_v9  ;;  %v53_v12 = vadd.f32 1e-12, %v52_v10 }
  0x9f   :  { %579 = vpow2.f32 %v216_v11 }
  0xa0   :  { %581 = vrsqrt.f32 %v53_v12  ;;  %v729_v13 = vpop.xlane.xlu0 %177 }
  0xa1   :  { %v179_v14 = vsub.f32 %v714_v4, %v729_v13 }
  0xa3   :  { %v180_v15 = vmul.f32 1.442695, %v179_v14 }
  0xa5   :  { %583 = vpow2.f32 %v180_v15 }
  0xac   :  { %v580_v16 = vpop.eup %579 }
  0xad   :  { %v582_v17 = vpop.eup %581  ;;  %v218_v18 = vsel %vm175_vm0, %v580_v16, 0.0 }
  0xae   :  { %219 = vadd.xlane.f32.xlu0 %v218_v18  ;;  %v55_v19 = vmul.f32 %v582_v17, %v47_v1 }
  0xb0   :  { %537 = vmatpush3.xpose.msk.msra.mxu0 %vm49_vm1, %v55_v19 }
  0xb1   :  { %548 = vmatprep.subr.mxu0 %v658_v7 }
  0xb2   :  { %v584_v20 = vpop.eup %583 }
  0xb3   :  { %539 = vmatmul.mubr.msk.f32.vlgmr.msra.gmra.mxu0 %vm49_vm1, %v55_v19  ;;  %v182_v22 = vsel %vm175_vm0, %v584_v20, 0.0 }
  0xb4   :  { %183 = vadd.xlane.f32.xlu1 %v182_v22  ;;  %552 = vmatprep.mubr.msk.f32.mxu0 %vm659_vm2, %v658_v7 }
  0xb5   :  { %549 = vmatpush3.msra.mxu0 %v526_v24 }
  0xb6   :  { %550 = vmatprep.subr.mxu0 %v658_v7 }
  0xb7   :  { %551 = vmatpush3.msra.mxu0 %v525_v25 }
  0xb8   :  { %343 = vmax.xlane.f32.xlu1 %v342_v23 }
 0x137   :  { %v220_v29 = vpop.xlane.xlu0 %219 }
 0x138   :  { %585 = vrcp.f32 %v220_v29 }
 0x13d   :  { %v758_v30 = vpop.xlane.xlu1 %183 }
 0x13e   :  { %587 = vrcp.f32 %v758_v30 }
 0x141   :  { %v344_v31 = vpop.xlane.xlu1 %343 }
 0x142   :  { %v345_v32 = vsub.f32 %v736_v21, %v344_v31 }
 0x144   :  { %v346_v33 = vmul.f32 1.442695, %v345_v32 }
 0x145   :  { %v586_v34 = vpop.eup %585 }
 0x146   :  { %589 = vpow2.f32 %v346_v33  ;;  %v339_v35 = vmul.f32 %v586_v34, %v580_v16 }
 0x147   :  { %591 = vlog2.f32 %v220_v29 }
 0x148   :  { %553 = vmatmul.mubr.msk.f32.vlgmr.msra.gmra.mxu0 %vm175_vm0, %v339_v35 }
 0x14b   :  { %v588_v36 = vpop.eup %587 }
 0x14c   :  { %v209_v37 = vmul.f32 %v588_v36, %v584_v20 }
 0x14e   :  { %546 = vmatmul.mubr.msk.f32.vlgmr.msra.gmra.mxu1 %vm175_vm0, %v209_v37 }
 0x153   :  { %v590_v38 = vpop.eup %589 }
 0x154   :  { %v348_v39 = vsel %vm175_vm0, %v590_v38, 0.0  ;;  %v592_v51 = vpop.eup %591 }
 0x155   :  { %349 = vadd.xlane.f32.xlu1 %v348_v39  ;;  %v222_v53 = vmul.f32 0.6931472, %v592_v51 }
 0x157   :  { %v223_v55 = vadd.f32 %v222_v53, %v725_v8 }
 0x159   :  { %v224_v57 = vsub.f32 %v707_v0, %v223_v55 }
 0x166   :  { %152 = vperm.xlu1 %577, %v150_v40  }
 0x16a   :  { %228 = vperm.xlu1 %577, %v520_v41  }
 0x16e   :  { %358 = vperm.xlu1 %577, %v523_v43  }
 0x173   :  { %v125_v46 = vpop.f32.mrf.mxu0 }
 0x174   :  { %v134_v47 = vmul.f32 14.285714, %v125_v46 }
 0x175   :  { %v540_v48 = vpop.f32.mrf.mxu0 }
 0x176   :  { %v777_v49 = vsel %vm133_vm3, -1e+30, %v134_v47 }
 0x177   :  { %v137_v50 = vsel %vm136_vm4, %v777_v49, -inf }
 0x178   :  { %138 = vmax.xlane.f32.xlu0 %v137_v50 }
 0x1de   :  { %v350_v52 = vpop.xlane.xlu1 %349 }
 0x1df   :  { %593 = vlog2.f32 %v350_v52 }
 0x1e2   :  { %v781_v54 = vpop.permute.xlu1 %152 }
 0x1e3   :  { %vm154_vm8 = vcmp.eq.s32.totalorder %v774_v45, %v781_v54 }
 0x1e6   :  { %v229_v56 = vpop.permute.xlu1 %228 }
 0x1e7   :  { %vm230_vm5 = vcmp.eq.s32.totalorder %v774_v45, %v229_v56 }
 0x1e8   :  { %v521_v58 = vsel %vm230_vm5, 1.0, %v658_v7 }
 0x1e9   :  { %v233_v59 = vmul.f32 %v521_v58, %v224_v57 }
 0x1ea   :  { %v359_v60 = vpop.permute.xlu1 %358 }
 0x1eb   :  { %v234_v61 = vsel %vm175_vm0, %v233_v59, 0.0  ;;  %vm360_vm6 = vcmp.eq.s32.totalorder %v774_v45, %v359_v60 }
 0x1ec   :  { %v594_v62 = vpop.eup %593  ;;  %235 = vadd.xlane.f32.xlu1 %v234_v61  ;;  %v524_v2 = vsel %vm360_vm6, 1.0, %v658_v7 }
 0x1ed   :  { %v352_v63 = vmul.f32 0.6931472, %v594_v62 }
 0x1ef   :  { %v353_v1 = vadd.f32 %v352_v63, %v344_v31 }
 0x1f1   :  { %v354_v3 = vsub.f32 %v736_v21, %v353_v1 }
 0x1f3   :  { %v363_v5 = vmul.f32 %v524_v2, %v354_v3 }
 0x1f5   :  { %v364_v6 = vsel %vm175_vm0, %v363_v5, 0.0 }
 0x1f6   :  { %365 = vadd.xlane.f32.xlu1 %v364_v6 }
 0x201   :  { %v139_v0 = vpop.xlane.xlu0 %138 }
 0x202   :  { %v140_v8 = vsub.f32 %v777_v49, %v139_v0 }
 0x204   :  { %v141_v9 = vmul.f32 1.442695, %v140_v8 }
 0x206   :  { %595 = vpow2.f32 %v141_v9 }
 0x208   :  { %v448_v10 = vpop.f32.mrf.mxu0 }
 0x209   :  { %v452_v11 = vmax.f32 %v448_v10, 1e-08 }
 0x20a   :  { %v554_v12 = vpop.f32.mrf.mxu0 }
 0x20b   :  { %597 = vlog2.f32 %v452_v11 }
 0x20e   :  { %v317_v14 = vpop.f32.mrf.mxu1 }
 0x20f   :  { %v321_v15 = vmax.f32 %v317_v14, 1e-08 }
 0x210   :  { %v547_v16 = vpop.f32.mrf.mxu1 }
 0x211   :  { %599 = vlog2.f32 %v321_v15 }
 0x212   :  { %601 = vlog2.f32 %v758_v30 }
 0x213   :  { %v596_v17 = vpop.eup %595 }
 0x214   :  { %v143_v18 = vsel %vm136_vm4, %v596_v17, 0.0 }
 0x215   :  { %144 = vadd.xlane.f32.xlu0 %v143_v18 }
 0x218   :  { %v598_v19 = vpop.eup %597 }
 0x219   :  { %v454_v20 = vmul.f32 0.6931472, %v598_v19 }
 0x21b   :  { %v455_v21 = vsub.f32 %v454_v20, %v354_v3 }
 0x21d   :  { %v456_v22 = vmul.f32 %v455_v21, %v452_v11 }
 0x21e   :  { %v600_v23 = vpop.eup %599 }
 0x21f   :  { %v323_v24 = vmul.f32 0.6931472, %v600_v23  ;;  %v602_v29 = vpop.eup %601 }
 0x220   :  { %v186_v32 = vmul.f32 0.6931472, %v602_v29 }
 0x221   :  { %v324_v25 = vsub.f32 %v323_v24, %v224_v57 }
 0x222   :  { %v187_v33 = vadd.f32 %v186_v32, %v729_v13  ;;  %v518_v13 = vsel %vm154_vm8, 1.0, %v658_v7 }
 0x223   :  { %v325_v26 = vmul.f32 %v324_v25, %v321_v15 }
 0x224   :  { %v188_v35 = vsub.f32 %v714_v4, %v187_v33  ;;  %v457_v4 = vsel %vm175_vm0, %v456_v22, 0.0 }
 0x225   :  { %v326_v27 = vsel %vm175_vm0, %v325_v26, 0.0 }
 0x226   :  { %327 = vadd.xlane.f32.xlu1 %v326_v27 }
 0x22b   :  { %191 = vperm.xlu0 %578, %v189_v28  }
 0x275   :  { %v236_v44 = vpop.xlane.xlu1 %235 }
 0x276   :  { %v237_v51 = vrot.slane %v236_v44, 4 }
 0x278   :  { %v238_v54 = vadd.f32 %v237_v51, %v236_v44 }
 0x27a   :  { %v239_v57 = vrot.slane %v238_v54, 2 }
 0x27c   :  { %v240_v3 = vadd.f32 %v239_v57, %v238_v54 }
 0x27e   :  { %v241_v12 = vrot.slane %v240_v3, 1 }
 0x27f   :  { %v366_v46 = vpop.xlane.xlu1 %365 }
 0x280   :  { %v242_v19 = vadd.f32 %v241_v12, %v240_v3 }
 0x29e   :  { %v145_v31 = vpop.xlane.xlu0 %144 }
 0x29f   :  { %603 = vlog2.f32 %v145_v31 }
 0x2a6   :  { %v192_v34 = vpop.permute.xlu0 %191 }
 0x2a7   :  { %vm193_vm7 = vcmp.eq.s32.totalorder %v774_v45, %v192_v34  ;;  %v367_v45 = vrot.slane %v366_v46, 4 }
 0x2a8   :  { %v519_v36 = vsel %vm193_vm7, 1.0, %v658_v7 }
 0x2a9   :  { %v196_v37 = vmul.f32 %v519_v36, %v188_v35  ;;  %v368_v55 = vadd.f32 %v367_v45, %v366_v46 }
 0x2ab   :  { %v197_v38 = vsel %vm175_vm0, %v196_v37, 0.0  ;;  %v369_v60 = vrot.slane %v368_v55, 2 }
 0x2ac   :  { %v604_v39 = vpop.eup %603  ;;  %198 = vadd.xlane.f32.xlu0 %v197_v38 }
 0x2ad   :  { %v147_v40 = vmul.f32 0.6931472, %v604_v39  ;;  %v370_v8 = vadd.f32 %v369_v60, %v368_v55 }
 0x2af   :  { %v148_v30 = vadd.f32 %v147_v40, %v139_v0  ;;  %v328_v48 = vpop.xlane.xlu1 %327  ;;  %v371_v17 = vrot.slane %v370_v8, 1 }
 0x2b0   :  { %v329_v52 = vrot.slane %v328_v48, 4 }
 0x2b1   :  { %v149_v41 = vsub.f32 %v777_v49, %v148_v30  ;;  %v372_v22 = vadd.f32 %v371_v17, %v370_v8 }
 0x2b2   :  { %v330_v49 = vadd.f32 %v329_v52, %v328_v48 }
 0x2b3   :  { %v157_v42 = vmul.f32 %v518_v13, %v149_v41 }
 0x2b4   :  { %v331_v59 = vrot.slane %v330_v49, 2 }
 0x2b5   :  { %v158_v43 = vsel %vm136_vm4, %v157_v42, 0.0 }
 0x2b6   :  { %159 = vadd.xlane.f32.xlu1 %v158_v43  ;;  %v332_v5 = vadd.f32 %v331_v59, %v330_v49 }
 0x2b8   :  { %v333_v14 = vrot.slane %v332_v5, 1 }
 0x2ba   :  { %458 = vadd.xlane.f32.xlu1 %v457_v4  ;;  %v334_v21 = vadd.f32 %v333_v14, %v332_v5 }
 0x335   :  { %v199_v47 = vpop.xlane.xlu0 %198 }
 0x336   :  { %v200_v50 = vrot.slane %v199_v47, 4 }
 0x338   :  { %v201_v53 = vadd.f32 %v200_v50, %v199_v47 }
 0x33a   :  { %v202_v7 = vrot.slane %v201_v53, 2 }
 0x33c   :  { %v203_v62 = vadd.f32 %v202_v7, %v201_v53 }
 0x33e   :  { %v204_v9 = vrot.slane %v203_v62, 1 }
 0x33f   :  { %v160_v56 = vpop.xlane.xlu1 %159 }
 0x340   :  { %v161_v58 = vrot.slane %v160_v56, 4  ;;  %v205_v18 = vadd.f32 %v204_v9, %v203_v62 }
 0x342   :  { %v162_v61 = vadd.f32 %v161_v58, %v160_v56 }
 0x343   :  { %v459_v63 = vpop.xlane.xlu1 %458 }
 0x344   :  { %v163_v1 = vrot.slane %v162_v61, 2  ;;  %v460_v2 = vrot.slane %v459_v63, 4 }
 0x346   :  { %v461_v6 = vadd.f32 %v460_v2, %v459_v63  ;;  %v164_v0 = vadd.f32 %v163_v1, %v162_v61 }
 0x348   :  { %v462_v10 = vrot.slane %v461_v6, 2  ;;  %v165_v11 = vrot.slane %v164_v0, 1 }
 0x34a   :  { %v463_v15 = vadd.f32 %v462_v10, %v461_v6  ;;  %v166_v16 = vadd.f32 %v165_v11, %v164_v0 }
 0x34c   :  { %555 = vpush %v166_v16  ;;  %v464_v20 = vrot.slane %v463_v15, 1 }
 0x34d   :  { %557 = vpush %v205_v18 }
 0x34e   :  { %559 = vpush %v242_v19  ;;  %v465_v23 = vadd.f32 %v464_v20, %v463_v15 }
 0x34f   :  { %561 = vpush %v334_v21 }
 0x350   :  { %563 = vpush %v372_v22 }
 0x351   :  { %565 = vpush %v465_v23 }
 0x37d   :  { %s556_s1 = spop %555 }
 0x37e   :  { %s168_s22 = ssub.f32 0.0, %s556_s1  ;;  %s558_s23 = spop %557 }
 0x37f   :  { %s207_s24 = ssub.f32 0.0, %s558_s23  ;;  %s560_s25 = spop %559 }
 0x380   :  { %s169_s26 = smul.f32 0.125, %s168_s22  ;;  %s562_s27 = spop %561 }
 0x381   :  { %s244_s28 = smul.f32 0.5, %s560_s25  ;;  %s564_s29 = spop %563 }
 0x382   :  { %171 = sst [smem:[#allocation8]] %s169_s26  ;;  %s374_s8 = smul.f32 0.25, %s564_s29 }
 0x383   :  { %s245_s30 = ssub.f32 %s207_s24, %s244_s28  ;;  %s336_s9 = smul.f32 0.3, %s562_s27 }
 0x384   :  { %s566_s0 = spop %565 }
 0x385   :  { %s375_s3 = ssub.f32 %s245_s30, %s374_s8  ;;  %s467_s10 = smul.f32 0.2, %s566_s0 }
 0x387   :  { %s470_s11 = smul.f32 0.125, %s375_s3  ;;  %s468_s12 = sadd.f32 %s467_s10, %s336_s9 }
 0x389   :  { %s475_s13 = smul.f32 0.125, %s468_s12  ;;  %473 = sst [smem:[#allocation5]] %s470_s11 }
 0x38a   :  { %486 = dma.smem_to_hbm %s662_s16, 16, %s824_s5, [#allocation4]  }
 0x38b   :  { %478 = sst [smem:[#allocation6]] %s475_s13 }
 0x38c   :  { %494 = dma.smem_to_hbm %s661_s14, 16, %s825_s6, [#allocation7]  }
 0x38d   :  { %502 = dma.smem_to_hbm %s663_s19, 16, %s826_s7, [#allocation7]  }
 0x38e   :  { %651 = dma.done.wait [#allocation4], 16  }
 0x38f   :  { %652 = vsyncadd [#allocation4], 4294967280 }
 0x390   :  { %653 = dma.done.wait [#allocation7], 32  }
 0x391   :  { %654 = vsyncadd [#allocation7], 4294967264 }
 0x392   :  { %512 = sfence }
 0x393   :  { %513 = vsyncpa [#allocation3], 1 }
 0x394   :  { %514 = vsyncpa [#allocation4], 1 }
 0x395   :  { %515 = vsyncpa [#allocation7], 1 }

</bundles_post_ra>
